<compile_context>
chip_gen: v6e
topology: v6e:2x2x1
jax: 0.10.0
libtpu: 0.0.40
codegen_flags: <defaults>
</compile_context>

<pallas_src>
import jax
import jax.numpy as jnp
from jax import lax
from jax.experimental import pallas as pl
from jax.experimental.pallas import tpu as pltpu

LN_EPS = 1e-5


def _pooler_kernel(cls_ref, gamma_ref, beta_ref, wt_ref, b_ref, out_ref):
    # cls_ref:   (Bt, D_in)      CLS rows for this batch tile
    # gamma_ref: (1, D_in)       LayerNorm scale
    # beta_ref:  (1, D_in)       LayerNorm shift
    # wt_ref:    (D_in, Tn)      pre-transposed weight block (W^T slice)
    # b_ref:     (1, Tn)         Linear bias slice
    # out_ref:   (Bt, Tn)
    x = cls_ref[...].astype(jnp.float32)

    # LayerNorm over the feature (lane) axis — f32 on all chip generations.
    mean = jnp.mean(x, axis=-1, keepdims=True)
    centered = x - mean
    var = jnp.mean(centered * centered, axis=-1, keepdims=True)
    inv_std = lax.rsqrt(var + LN_EPS)
    normed = (centered * inv_std * gamma_ref[...].astype(jnp.float32)
              + beta_ref[...].astype(jnp.float32))
    # TODO(synk): gamma/beta could be folded into W^T / bias at prep time, but
    # the kernel is weight-DMA-bound so these VPU ops are free filler.

    # Linear with the pre-transposed weight: standard (1,)x(0,) contraction,
    # MXU-native, no in-kernel transpose. MXU operand dtype == wt dtype.
    lhs = normed.astype(wt_ref.dtype)
    proj = lax.dot_general(
        lhs, wt_ref[...],
        dimension_numbers=(((1,), (0,)), ((), ())),
        preferred_element_type=jnp.float32)
    proj = proj + b_ref[...].astype(jnp.float32)
    out_ref[...] = jnp.tanh(proj).astype(out_ref.dtype)


def prepare_pooler_params(gamma, beta, weight, bias, *, matmul_dtype=jnp.float32):
    """One-time parameter prep (call OUTSIDE the per-step forward).

    Transposes the PyTorch-layout (D_out, D_in) weight to W^T (D_in, D_out)
    and stores it in the MXU dtype, so the forward pass never pays a per-call
    astype/transpose. Returns (gamma2, beta2, w_t, bias2).
    """
    D_out, D_in = weight.shape
    w_t = jnp.asarray(weight).T.astype(matmul_dtype)          # (D_in, D_out)
    gamma2 = jnp.asarray(gamma).reshape(1, D_in).astype(jnp.float32)
    beta2 = jnp.asarray(beta).reshape(1, D_in).astype(jnp.float32)
    bias2 = jnp.asarray(bias).reshape(1, D_out).astype(jnp.float32)
    return gamma2, beta2, w_t, bias2


def _round_down(x, m):
    return max(m, (x // m) * m)


def _choose_block_b(B, matmul_dtype):
    # bf16 packs 16 sublanes per vreg; f32 packs 8.
    align = 16 if jnp.dtype(matmul_dtype).itemsize <= 2 else 8
    if B < 128 or B < 4 * align:
        # Small pooler batches: single grid step — avoids duplicating the
        # weight fetch per TensorCore under megacore sharding when the kernel
        # is weight-DMA-bound, and avoids pointless pipeline overhead.
        return B
    # 2-4 pipelined grid steps so the strided CLS DMA / output writeback hide
    # behind the matmul, while keeping >=64 rows to fill the MXU M dimension.
    return min(_round_down(B // 4, align), 256)


def _choose_block_n(D_in, D_out, w_itemsize):
    # Keep W^T within a ~16 MiB VMEM budget (safe on v7x: 64 MiB physical,
    # 32 MiB default scoped). If it does not fit, tile D_out (double-buffered
    # weight slices of <= budget/2 each).
    budget = 16 << 20
    if D_in * D_out * w_itemsize <= budget:
        return D_out
    tn = (budget // 2) // (D_in * w_itemsize)
    tn = max(128, _round_down(tn, 128))
    return min(tn, D_out)


def pooler_forward(x, gamma2, beta2, w_t, bias2, *, out_dtype=None,
                   block_b=None, block_n=None):
    """x: (B, S, D_in); params from `prepare_pooler_params`. Returns (B, D_out)."""
    B, S, D_in = x.shape
    D_in_w, D_out = w_t.shape
    assert D_in_w == D_in, "weight must be pre-transposed to (D_in, D_out)"
    if out_dtype is None:
        out_dtype = x.dtype
    matmul_dtype = w_t.dtype
    w_itemsize = jnp.dtype(matmul_dtype).itemsize

    bt = _choose_block_b(B, matmul_dtype) if block_b is None else block_b
    assert bt == B or bt % 8 == 0, "block_b must be a multiple of 8 or equal B"
    tn = _choose_block_n(D_in, D_out, w_itemsize) if block_n is None else block_n
    gb = pl.cdiv(B, bt)
    gn = pl.cdiv(D_out, tn)
    # D_out axis outermost so a weight slice stays resident across all batch
    # steps (weight fetched gn times total, not gn*gb times).
    grid = (gn, gb)

    # Fuse CLS extraction into the input DMA when the feature width is
    # lane-aligned: flatten (B, S, D_in) -> (B, S*D_in) (free reshape); the
    # (bt, D_in) window at column-block 0 reads exactly x[:, 0, :].
    if D_in % 128 == 0 or S == 1:
        cls_src = x.reshape(B, S * D_in)
    else:
        # TODO(synk): non-lane-aligned D_in falls back to an XLA slice (one
        # extra HBM round trip of the CLS slab).
        cls_src = x[:, 0, :]

    single = pl.Buffered(1)          # grid-invariant operands: single-buffer
    weight_invariant = (gn == 1)

    def _spec(shape, index_map, single_buffer):
        if single_buffer:
            return pl.BlockSpec(shape, index_map, pipeline_mode=single)
        return pl.BlockSpec(shape, index_map)

    in_specs = [
        pl.BlockSpec((bt, D_in), lambda n, b: (b, 0)),                 # CLS rows
        _spec((1, D_in), lambda n, b: (0, 0), True),                   # gamma (resident)
        _spec((1, D_in), lambda n, b: (0, 0), True),                   # beta  (resident)
        _spec((D_in, tn), lambda n, b: (0, n), weight_invariant),      # W^T
        _spec((1, tn), lambda n, b: (0, n), weight_invariant),         # bias
    ]
    out_specs = pl.BlockSpec((bt, tn), lambda n, b: (b, n))

    # Explicit scoped-VMEM limit (v5e default 16 MiB is already tight).
    w_bufs = 1 if weight_invariant else 2
    est_vmem = (w_bufs * D_in * tn * w_itemsize
                + 2 * bt * D_in * jnp.dtype(x.dtype).itemsize
                + 2 * bt * tn * jnp.dtype(out_dtype).itemsize
                + 4 * D_in * 4 + 4 * tn * 4)
    vmem_limit = int(min(max(est_vmem + est_vmem // 4 + (4 << 20), 32 << 20),
                         48 << 20))

    cost = pl.CostEstimate(
        flops=2 * B * D_in * D_out * gn // gn + 8 * B * D_in,
        transcendentals=B * D_out + B,
        bytes_accessed=(D_in * D_out * w_itemsize
                        + gn * B * D_in * jnp.dtype(x.dtype).itemsize
                        + B * D_out * jnp.dtype(out_dtype).itemsize))

    out = pl.pallas_call(
        _pooler_kernel,
        out_shape=jax.ShapeDtypeStruct((B, D_out), out_dtype),
        grid=grid,
        in_specs=in_specs,
        out_specs=out_specs,
        compiler_params=pltpu.CompilerParams(
            dimension_semantics=("parallel", "parallel"),
            vmem_limit_bytes=vmem_limit),
        cost_estimate=cost,
    )(cls_src, gamma2, beta2, w_t, bias2)
    return out


def _reference(x, gamma, beta, weight, bias):
    """Pure-JAX reference replicating the PyTorch forward."""
    cls_rep = x[:, 0, :].astype(jnp.float32)
    mean = jnp.mean(cls_rep, axis=-1, keepdims=True)
    var = jnp.mean((cls_rep - mean) ** 2, axis=-1, keepdims=True)
    normed = (cls_rep - mean) / jnp.sqrt(var + LN_EPS) * gamma + beta
    return jnp.tanh(normed @ weight.T + bias)


if __name__ == "__main__":
    key = jax.random.PRNGKey(0)
    # Small but lane-aligned shapes (exercises the fused CLS path).
    B, S, D_in, D_out = 16, 8, 256, 128

    k_x, k_g, k_b, k_w, k_bias = jax.random.split(key, 5)
    x = jax.random.normal(k_x, (B, S, D_in), dtype=jnp.float32)

    # Deterministic synthetic parameters (shapes per nn.LayerNorm / nn.Linear).
    gamma = 1.0 + 0.01 * jax.random.normal(k_g, (D_in,), dtype=jnp.float32)
    beta = 0.01 * jax.random.normal(k_b, (D_in,), dtype=jnp.float32)
    weight = 0.05 * jax.random.normal(k_w, (D_out, D_in), dtype=jnp.float32)
    bias = 0.01 * jax.random.normal(k_bias, (D_out,), dtype=jnp.float32)

    ref = _reference(x, gamma, beta, weight, bias)

    # f32 MXU path — bitwise-faithful to the module semantics; block_b=8
    # forces a 2-step pipelined batch grid.
    params_f32 = prepare_pooler_params(gamma, beta, weight, bias,
                                       matmul_dtype=jnp.float32)
    out = pooler_forward(x, *params_f32, block_b=8)
    jax.block_until_ready(out)
    assert out.shape == (B, D_out)
    assert jnp.allclose(out, ref, atol=1e-5, rtol=1e-5), "f32 path mismatch vs reference"

    # bf16 MXU operands (f32 accumulation) — fast path on v5e / v6e / v7x.
    # Weight is converted + transposed ONCE here, never per forward call.
    params_bf16 = prepare_pooler_params(gamma, beta, weight, bias,
                                        matmul_dtype=jnp.bfloat16)
    out_bf16 = pooler_forward(x, *params_bf16)
    jax.block_until_ready(out_bf16)
    assert jnp.allclose(out_bf16.astype(jnp.float32), ref, atol=3e-2, rtol=3e-2), \
        "bf16-matmul path mismatch vs reference"

    print("KERNEL_OK")
</pallas_src>

<mosaic_0001>
module attributes {stable_mosaic.version = 11 : i64} {
  func.func @_pooler_kernel(%arg0: i32, %arg1: i32, %arg2: memref<8x256xf32, #tpu.memory_space<vmem>>, %arg3: memref<1x256xf32, #tpu.memory_space<vmem>>, %arg4: memref<1x256xf32, #tpu.memory_space<vmem>>, %arg5: memref<256x128xf32, #tpu.memory_space<vmem>>, %arg6: memref<1x128xf32, #tpu.memory_space<vmem>>, %arg7: memref<8x128xf32, #tpu.memory_space<vmem>>) attributes {dimension_semantics = [#tpu.dimension_semantics<parallel>, #tpu.dimension_semantics<parallel>], iteration_bounds = array<i64: 1, 2>, scalar_prefetch = 0 : i64, scratch_operands = 0 : i64, tpu.core_type = #tpu.core_type<tc>, window_params = [{transform_indices = @transform_0, window_bounds = array<i64: 8, 256>}, {pipeline_mode = #tpu.pipeline_mode<synchronous>, transform_indices = @transform_1, window_bounds = array<i64: 1, 256>}, {pipeline_mode = #tpu.pipeline_mode<synchronous>, transform_indices = @transform_2, window_bounds = array<i64: 1, 256>}, {pipeline_mode = #tpu.pipeline_mode<synchronous>, transform_indices = @transform_3, window_bounds = array<i64: 256, 128>}, {pipeline_mode = #tpu.pipeline_mode<synchronous>, transform_indices = @transform_4, window_bounds = array<i64: 1, 128>}, {transform_indices = @transform_5, window_bounds = array<i64: 8, 128>}]} {
    %c0 = arith.constant 0 : index
    %c0_0 = arith.constant 0 : index
    %0 = vector.load %arg2[%c0, %c0_0] : memref<8x256xf32, #tpu.memory_space<vmem>>, vector<8x256xf32>
    %cst = arith.constant dense<0.000000e+00> : vector<8xf32>
    %1 = vector.multi_reduction <add>, %0, %cst [1] : vector<8x256xf32> to vector<8xf32>
    %2 = vector.shape_cast %1 : vector<8xf32> to vector<8x1xf32>
    %cst_1 = arith.constant 2.560000e+02 : f32
    %3 = vector.broadcast %cst_1 : f32 to vector<8x1xf32>
    %4 = arith.divf %2, %3 : vector<8x1xf32>
    %5 = vector.broadcast %4 : vector<8x1xf32> to vector<8x256xf32>
    %6 = arith.subf %0, %5 : vector<8x256xf32>
    %7 = arith.mulf %6, %6 : vector<8x256xf32>
    %cst_2 = arith.constant dense<0.000000e+00> : vector<8xf32>
    %8 = vector.multi_reduction <add>, %7, %cst_2 [1] : vector<8x256xf32> to vector<8xf32>
    %9 = vector.shape_cast %8 : vector<8xf32> to vector<8x1xf32>
    %cst_3 = arith.constant 2.560000e+02 : f32
    %10 = vector.broadcast %cst_3 : f32 to vector<8x1xf32>
    %11 = arith.divf %9, %10 : vector<8x1xf32>
    %cst_4 = arith.constant 9.99999974E-6 : f32
    %12 = vector.broadcast %cst_4 : f32 to vector<8x1xf32>
    %13 = arith.addf %11, %12 : vector<8x1xf32>
    %14 = math.rsqrt %13 : vector<8x1xf32>
    %15 = vector.broadcast %14 : vector<8x1xf32> to vector<8x256xf32>
    %16 = arith.mulf %6, %15 : vector<8x256xf32>
    %c0_5 = arith.constant 0 : index
    %c0_6 = arith.constant 0 : index
    %17 = vector.load %arg3[%c0_5, %c0_6] : memref<1x256xf32, #tpu.memory_space<vmem>>, vector<1x256xf32>
    %18 = vector.broadcast %17 : vector<1x256xf32> to vector<8x256xf32>
    %19 = arith.mulf %16, %18 : vector<8x256xf32>
    %c0_7 = arith.constant 0 : index
    %c0_8 = arith.constant 0 : index
    %20 = vector.load %arg4[%c0_7, %c0_8] : memref<1x256xf32, #tpu.memory_space<vmem>>, vector<1x256xf32>
    %21 = vector.broadcast %20 : vector<1x256xf32> to vector<8x256xf32>
    %22 = arith.addf %19, %21 : vector<8x256xf32>
    %c0_9 = arith.constant 0 : index
    %c0_10 = arith.constant 0 : index
    %23 = vector.load %arg5[%c0_9, %c0_10] : memref<256x128xf32, #tpu.memory_space<vmem>>, vector<256x128xf32>
    %cst_11 = arith.constant dense<0.000000e+00> : vector<8x128xf32>
    %24 = tpu.matmul %22, %23, %cst_11 {dimension_numbers = #tpu.dot_dimension_numbers<[1], [0], [0], [1], [0, 0, 1, 1], [], []>} : vector<8x256xf32>, vector<256x128xf32>, vector<8x128xf32> -> vector<8x128xf32>
    %c0_12 = arith.constant 0 : index
    %c0_13 = arith.constant 0 : index
    %25 = vector.load %arg6[%c0_12, %c0_13] : memref<1x128xf32, #tpu.memory_space<vmem>>, vector<1x128xf32>
    %26 = vector.broadcast %25 : vector<1x128xf32> to vector<8x128xf32>
    %27 = arith.addf %24, %26 : vector<8x128xf32>
    %28 = math.tanh %27 : vector<8x128xf32>
    %c0_14 = arith.constant 0 : index
    %c0_15 = arith.constant 0 : index
    %29 = vector.load %arg7[%c0_14, %c0_15] : memref<8x128xf32, #tpu.memory_space<vmem>>, vector<8x128xf32>
    tpu.vector_store %arg7[%c0_14, %c0_15], %28 {strides = array<i32>} : memref<8x128xf32, #tpu.memory_space<vmem>>, vector<8x128xf32>,
    return
  }
  func.func @transform_0(%arg0: i32, %arg1: i32) -> (i32, i32) {
    %c0_i32 = arith.constant 0 : i32
    %c0_i32_0 = arith.constant 0 : i32
    return %arg1, %c0_i32 : i32, i32
  }
  func.func @transform_1(%arg0: i32, %arg1: i32) -> (i32, i32) {
    %c0_i32 = arith.constant 0 : i32
    %c0_i32_0 = arith.constant 0 : i32
    %c0_i32_1 = arith.constant 0 : i32
    return %c0_i32, %c0_i32_0 : i32, i32
  }
  func.func @transform_2(%arg0: i32, %arg1: i32) -> (i32, i32) {
    %c0_i32 = arith.constant 0 : i32
    %c0_i32_0 = arith.constant 0 : i32
    %c0_i32_1 = arith.constant 0 : i32
    return %c0_i32, %c0_i32_0 : i32, i32
  }
  func.func @transform_3(%arg0: i32, %arg1: i32) -> (i32, i32) {
    %c0_i32 = arith.constant 0 : i32
    %c0_i32_0 = arith.constant 0 : i32
    return %c0_i32, %arg0 : i32, i32
  }
  func.func @transform_4(%arg0: i32, %arg1: i32) -> (i32, i32) {
    %c0_i32 = arith.constant 0 : i32
    %c0_i32_0 = arith.constant 0 : i32
    return %c0_i32, %arg0 : i32, i32
  }
  func.func @transform_5(%arg0: i32, %arg1: i32) -> (i32, i32) {
    %c0_i32 = arith.constant 0 : i32
    return %arg1, %arg0 : i32, i32
  }
}

</mosaic_0001>

<bundles_post_ra>
// kernel: tpu_custom_call.1
= control target key start
LH: loop header
LB: loop body
LE: loop exit
PB: predicated region body
PF: predicated region fallthrough
CT: control target
= control target key end

     0   :  { %s1132_s0 = inlined_call_operand.hbm [shape: f32[16,2048], index: 0, kind: input, shape index: {}]   ;;  %s1133_s1 = inlined_call_operand.hbm [shape: f32[1,256], index: 1, kind: input, shape index: {}]   ;;  %s1134_s2 = inlined_call_operand.vmem [shape: f32[1,256], index: 2, kind: input, shape index: {}]   ;;  %s1135_s3 = inlined_call_operand.hbm [shape: f32[256,128], index: 3, kind: input, shape index: {}]   ;;  %s1136_s4 = inlined_call_operand.vmem [shape: f32[1,128], index: 4, kind: input, shape index: {}]   ;;  %s1137_s5 = inlined_call_operand.hbm [shape: f32[16,128], index: 5, kind: output, shape index: {}]  }
   0x1   :  { %1142 = sst [smem:[#allocation12_spill]] %s1133_s1 }
   0x2   :  { %10 = vsyncpa [#allocation3], 0 }
   0x3   :  { %12 = vsyncpa [#allocation3 + $0x1], 0 }
   0x4   :  { %13 = vsyncpa [#allocation6], 0 }
   0x5   :  { %14 = vsyncpa [#allocation4], 0 }
   0x6   :  { %16 = vsyncpa [#allocation4 + $0x1], 0  ;;  %s935_s18 = smov 0   ;;  %s937_s19 = smov 0  }
   0x7   :  { %s939_s20 = smov 0   ;;  %s941_s21 = smov 0  }
   0x8   :  { %s943_s22 = smov 0   ;;  %s945_s23 = smov 0  }
   0x9 LB: > { %s588_s24 = sadd.s32 4294967295, %s897_s23   ;;  %s589_s25 = sadd.s32 4294967294, %s897_s23   ;;  %s897_s23 = sphi %s945_s23, %s22_s23   ;;  %s893_s22 = sphi %s943_s22, %s1162_s22   ;;  %s889_s21 = sphi %s941_s21, %s1161_s21   ;;  %s885_s20 = sphi %s939_s20, %s1160_s20   ;;  %s881_s19 = sphi %s937_s19, %s1159_s19   ;;  %s877_s18 = sphi %s935_s18, %s1158_s18  }
   0xa   : > { %p54_p0 = scmp.ne.s32.totalorder %s881_s19, %s877_s18  ;;  %p969_p1 = scmp.eq.s32.totalorder %s588_s24, 0 }
   0xb   : > { %p973_p2 = scmp.eq.s32.totalorder %s588_s24, 1  ;;  %p180_p3 = scmp.eq.s32.totalorder %s589_s25, 1 }
   0xc   : > { %s1143_s26 = scalar_select %p969_p1, 1, 0 }
   0xd   : > { %s1144_s27 = scalar_select %p973_p2, 1, 0 }
   0xe   : > { %p979_p4 = por %p969_p1, %p54_p0  ;;  %p590_p5 = scmp.ge.s32.totalorder %s897_s23, 1 }
   0xf   : > { %p984_p6 = por %p180_p3, %p54_p0  ;;  %p187_p7 = scmp.lt.s32.totalorder %s897_s23, 3 }
  0x10   : > { %s1145_s28 = scalar_select %p979_p4, 1, 0 }
  0x11   : > { %s1146_s29 = scalar_select %p984_p6, 1, 0 }
  0x12   : > { %p989_p8 = pnand %p590_p5, %p187_p7  ;;  %s899_s6 = smov [#allocation5]  }
  0x13   : > { %s200_s7 = sshll.u32 %s899_s6, 4  ;;  %s900_s8 = smov [#allocation7]   ;;  %s201_s7 = int_to_ptr.vmem [resolvable:$true] %s200_s7 }
  0x14   : > { %s1147_s30 = scalar_select %p989_p8, 1, 0 }
  0x15   : > { %p656_p10 = pneg %p989_p8  ;;  %s215_s9 = sshll.u32 %s900_s8, 4  ;;  %s216_s9 = int_to_ptr.vmem [resolvable:$true] %s215_s9 }
  0x16   : > { %s744_s11 = scalar_lea.vmem %s201_s7, 32  ;;  %p752_p5 = scmp.lt.s32.totalorder %s201_s7, %s201_s7 }
  0x17   : > { %p998_p11 = pnand %p656_p10, %p969_p1  ;;  %p745_p13 = scmp.ne.s32.totalorder %s201_s7, %s744_s11 }
  0x18   : > { %p753_p7 = scmp.lt.s32.totalorder %s744_s11, %s744_s11 }
  0x19   : > { %p735_p12 = pneg %p998_p11 }
  0x1a   : > { %p754_p9 = por %p753_p7, %p752_p5 }
  0x1b   : > { %p747_p0 = pnand %p745_p13, %p735_p12 }
  0x1d   : > { %p748_p3 = pneg %p747_p0 }
  0x1f   : > { %p755_p6 = pnand %p754_p9, %p748_p3 }
  0x21   : > { %758 = shalt.err (!%p755_p6)
}
  0x22   : > { %s1149_s1 = sld [smem:[#allocation12_spill]]  ;;  %s770_s14 = scalar_lea.vmem %s216_s9, 4096 }
  0x23   : > { %p771_p10 = scmp.ne.s32.totalorder %s216_s9, %s770_s14  ;;  %p778_p13 = scmp.lt.s32.totalorder %s216_s9, %s216_s9 }
  0x24   : > { %p779_p0 = scmp.lt.s32.totalorder %s770_s14, %s770_s14 }
  0x25   : > { %p773_p1 = pnand %p771_p10, %p735_p12 }
  0x26   : > { %p780_p8 = por %p779_p0, %p778_p13 }
  0x27   : > { %p774_p4 = pneg %p773_p1 }
  0x28   : > { %659 = dma.hbm_to_vmem [thread:$0]  (!%p998_p11), %s1149_s1, 32, %s201_s7, [#allocation6]  }
  0x29   : > { %p781_p2 = pnand %p780_p8, %p774_p4 }
  0x2b   : > { %784 = shalt.err (!%p781_p2)
}
  0x2c   : > { %s901_s15 = smov 128   ;;  %s902_s16 = smov 8  }
  0x2d   : > { %662 = dma.hbm_to_vmem [thread:$0]  (!%p998_p11), %s1135_s3, 4096, %s216_s9, [#allocation6], %s901_s15, %s901_s15, %s902_s16  }
  0x2e   : > { %s31_s25 = sadd.s32 1, %s893_s22  ;;  %s41_s6 = sadd.s32 1, %s885_s20 }
  0x2f   : > { %p32_p1 = scmp.ge.s32.totalorder %s31_s25, 2  ;;  %p48_p2 = scmp.ne.s32.totalorder %s885_s20, %s881_s19 }
  0x30   : > { %p49_p4 = scmp.eq.s32.totalorder %s897_s23, 0  ;;  %p673_p6 = scmp.lt.s32.totalorder %s897_s23, 2 }
  0x31   : > { %s1164_s25 = smov (%p32_p1, %s31_s25), 0  ;;  %p1150_p9 = scmp.ne.s32.totalorder %s1144_s27, 0 }
  0x32   : > { %p50_p8 = por %p49_p4, %p48_p2  ;;  %s38_s8 = ssub.s32 %s893_s22, %s1164_s25 }
  0x33   : > { %p1030_p12 = por %p1150_p9, %p48_p2  ;;  %s235_s10 = sand.u32 1, %s885_s20  }
  0x34   : > { %p39_p3 = scmp.eq.s32.totalorder %s38_s8, 0  ;;  %s595_s9 = sshll.u32 %s235_s10, 4 }
  0x35   : > { %s608_s11 = sshll.u32 %s893_s22, 11  ;;  %s239_s16 = scalar_lea.vmem [#allocation2], %s595_s9 }
  0x36   : > { %s1039_s12 = scalar_select %p39_p3, %s885_s20, %s41_s6  }
  0x37   : > { %s245_s15 = scalar_lea.hbm %s1132_s0, %s608_s11  ;;  %s247_s17 = sshll.u32 %s239_s16, 4  ;;  %s248_s17 = int_to_ptr.vmem [resolvable:$true] %s247_s17 }
  0x38   : > { %p1046_p11 = pnand %p673_p6, %p50_p8  ;;  %s236_s24 = scalar_lea.sflag [#allocation3], %s235_s10 }
  0x39   : > { %s798_s8 = scalar_lea.vmem %s248_s17, 256  ;;  %s903_s6 = smov [#allocation2]  }
  0x3a   : > { %p787_p5 = pneg %p1046_p11  ;;  %p799_p7 = scmp.ne.s32.totalorder %s248_s17, %s798_s8 }
  0x3b   : > { %s803_s1 = sshll.u32 %s903_s6, 4  ;;  %s804_s1 = int_to_ptr.vmem [resolvable:$false] %s803_s1 }
  0x3c   : > { %p801_p10 = pnand %p799_p7, %p787_p5  ;;  %s805_s11 = scalar_lea.vmem %s804_s1, 512 }
  0x3d   : > { %p806_p0 = scmp.lt.s32.totalorder %s248_s17, %s804_s1  ;;  %p807_p1 = scmp.lt.s32.totalorder %s805_s11, %s798_s8 }
  0x3e   : > { %p802_p13 = pneg %p801_p10 }
  0x3f   : > { %p808_p2 = por %p807_p1, %p806_p0 }
  0x41   : > { %p809_p4 = pnand %p808_p2, %p802_p13 }
  0x43   : > { %812 = shalt.err (!%p809_p4)
}
  0x44   : > { %666 = dma.hbm_to_vmem [thread:$0]  (!%p1046_p11), %s245_s15, 256, %s248_s17, %s236_s24  }
  0x45   : > { %p1153_p6 = scmp.ne.s32.totalorder %s1147_s30, 0 }
  0x46   : > { %s1057_s10 = sand.u32 (!%p1153_p6), 1, %s881_s19   ;;  %p1154_p8 = scmp.ne.s32.totalorder (!%p1153_p6), %s1145_s28, 0 }
  0x47   : > { %256 = sbr.rel (%p1153_p6) target bundleno = 618 (0x26a), region = 40  ;;  %s599_s9 = sshll.u32 (!%p1153_p6), %s1057_s10, 4 }
  0x48   : > { %s259_s13 = scalar_lea.sflag (!%p1153_p6), [#allocation3], %s1057_s10  ;;  %s262_s14 = scalar_lea.vmem (!%p1153_p6), [#allocation2], %s599_s9 }
  0x4c   : > { %864 = dma.done.wait (%p1154_p8), %s259_s13, 256  }
  0x4d   : > { %866 = vsyncadd (%p1154_p8), %s259_s13, 4294967040  ;;  %p1155_p9 = scmp.ne.s32.totalorder %s1143_s26, 0 }
  0x4f   : > { %868 = dma.done.wait (%p1155_p9), [#allocation6], 4128  }
  0x50   : > { %870 = vsyncadd (%p1155_p9), [#allocation6], 4294963168  ;;  %v303_v0 = vld [vmem:[%s262_s14] sm:$0xff]  ;;  %v304_v1 = vld [vmem:[%s262_s14 + $0x8] sm:$0xff]  ;;  %v324_v45 = vlaneseq  ;;  %s602_s15 = sshll.u32 %s1057_s10, 3  ;;  %s605_s16 = sshll.u32 %s889_s21, 7 }
  0x51   : > { %v305_v2 = vadd.f32 %v304_v1, %v303_v0  ;;  %v381_v3 = vld [vmem:[#allocation7 + $0xf8] sm:$0xff]  ;;  %v380_v5 = vld [vmem:[#allocation7 + $0xf0] sm:$0xff]  ;;  %v379_v7 = vld [vmem:[#allocation7 + $0xe8] sm:$0xff]  ;;  %s299_s17 = scalar_lea.vmem [#allocation8], %s602_s15  ;;  %s1090_s6 = scalar_lea.hbm %s1137_s5, %s605_s16 }
  0x52   : > { %v365_v4 = vld [vmem:[#allocation7 + $0x78] sm:$0xff]  ;;  %609 = vmatprep.subr.mxu0 %v381_v3  ;;  %v364_v6 = vld [vmem:[#allocation7 + $0x70] sm:$0xff]  ;;  %v363_v8 = vld [vmem:[#allocation7 + $0x68] sm:$0xff]  ;;  %v325_v46 = vshrl.u32 %v324_v45, 7  ;;  %s476_s27 = sshll.u32 %s299_s17, 4  ;;  %s462_s11 = scalar_lea.sflag [#allocation4], %s1057_s10  ;;  %s477_s27 = int_to_ptr.vmem [resolvable:$true] %s476_s27 }
  0x53   : > { %306 = vadd.xlane.f32.xlu0 %v305_v2  ;;  %610 = vmatpush3.msra.mxu0 %v365_v4  ;;  %v378_v9 = vld [vmem:[#allocation7 + $0xe0] sm:$0xff]  ;;  %v377_v18 = vld [vmem:[#allocation7 + $0xd8] sm:$0xff]  ;;  %v376_v20 = vld [vmem:[#allocation7 + $0xd0] sm:$0xff]  ;;  %s813_s9 = scalar_lea.vmem %s477_s27, 128  ;;  %s904_s13 = smov [#allocation8]  }
  0x54   : > { %611 = vmatprep.subr.mxu0 %v380_v5  ;;  %v362_v17 = vld [vmem:[#allocation7 + $0x60] sm:$0xff]  ;;  %v361_v19 = vld [vmem:[#allocation7 + $0x58] sm:$0xff]  ;;  %v360_v21 = vld [vmem:[#allocation7 + $0x50] sm:$0xff]  ;;  %v326_v47 = vsub.s32 0, %v325_v46  ;;  %v330_v48 = vsub.s32 1, %v325_v46  ;;  %p814_p3 = scmp.ne.s32.totalorder %s477_s27, %s813_s9  ;;  %s817_s14 = sshll.u32 %s904_s13, 4  ;;  %s818_s14 = int_to_ptr.vmem [resolvable:$false] %s817_s14 }
  0x55   : > { %612 = vmatpush3.msra.mxu0 %v364_v6  ;;  %v375_v22 = vld [vmem:[#allocation7 + $0xc8] sm:$0xff]  ;;  %v374_v24 = vld [vmem:[#allocation7 + $0xc0] sm:$0xff]  ;;  %v373_v26 = vld [vmem:[#allocation7 + $0xb8] sm:$0xff]  ;;  %s819_s21 = scalar_lea.vmem %s818_s14, 256  ;;  %p820_p7 = scmp.lt.s32.totalorder %s477_s27, %s818_s14 }
  0x56   : > { %613 = vmatprep.subr.mxu0 %v379_v7  ;;  %v359_v23 = vld [vmem:[#allocation7 + $0x48] sm:$0xff]  ;;  %v358_v25 = vld [vmem:[#allocation7 + $0x40] sm:$0xff]  ;;  %v357_v27 = vld [vmem:[#allocation7 + $0x38] sm:$0xff]  ;;  %p815_p11 = pnand %p814_p3, %p1030_p12  ;;  %p821_p10 = scmp.lt.s32.totalorder %s819_s21, %s813_s9 }
  0x57   : > { %614 = vmatpush3.msra.mxu0 %v363_v8  ;;  %v372_v28 = vld [vmem:[#allocation7 + $0xb0] sm:$0xff]  ;;  %v371_v30 = vld [vmem:[#allocation7 + $0xa8] sm:$0xff]  ;;  %v370_v32 = vld [vmem:[#allocation7 + $0xa0] sm:$0xff] }
  0x58   : > { %615 = vmatprep.subr.mxu0 %v378_v9  ;;  %v356_v29 = vld [vmem:[#allocation7 + $0x30] sm:$0xff]  ;;  %v355_v31 = vld [vmem:[#allocation7 + $0x28] sm:$0xff]  ;;  %v354_v33 = vld [vmem:[#allocation7 + $0x20] sm:$0xff]  ;;  %p816_p5 = pneg %p815_p11  ;;  %p822_p13 = por %p821_p10, %p820_p7 }
  0x59   : > { %616 = vmatpush3.msra.mxu0 %v362_v17  ;;  %v369_v34 = vld [vmem:[#allocation7 + $0x98] sm:$0xff]  ;;  %v368_v36 = vld [vmem:[#allocation7 + $0x90] sm:$0xff]  ;;  %v367_v38 = vld [vmem:[#allocation7 + $0x88] sm:$0xff] }
  0x5a   : > { %617 = vmatprep.subr.mxu0 %v377_v18  ;;  %v353_v35 = vld [vmem:[#allocation7 + $0x18] sm:$0xff]  ;;  %v352_v37 = vld [vmem:[#allocation7 + $0x10] sm:$0xff]  ;;  %v351_v39 = vld [vmem:[#allocation7 + $0x8] sm:$0xff]  ;;  %p823_p0 = pnand %p822_p13, %p816_p5 }
  0x5b   : > { %618 = vmatpush3.msra.mxu0 %v361_v19  ;;  %v366_v40 = vld [vmem:[#allocation7 + $0x80] sm:$0xff]  ;;  %v322_v49 = vld [vmem:[#allocation5] sm:$0x3] }
  0x5c   : > { %619 = vmatprep.subr.mxu0 %v376_v20  ;;  %v350_v41 = vld [vmem:[#allocation7] sm:$0xff]  ;;  %v336_v50 = vld [vmem:[%s1134_s2] sm:$0x3]  ;;  %v327_v51 = vrot.slane %v322_v49, %v326_v47  ;;  %v331_v52 = vrot.slane %v322_v49, %v330_v48 }
  0x5d   : > { %620 = vmatpush3.msra.mxu0 %v360_v21  ;;  %v341_v55 = vrot.slane %v336_v50, %v326_v47  ;;  %v345_v56 = vrot.slane %v336_v50, %v330_v48  ;;  %v603_v63 = vld [vmem:[%s1136_s4] ss:$0 sm:$0xff] }
  0x5e   : > { %621 = vmatprep.subr.mxu0 %v375_v22 }
  0x5f   : > { %622 = vmatpush3.msra.mxu0 %v359_v23 }
  0x60   : > { %623 = vmatprep.subr.mxu0 %v374_v24 }
  0x61   : > { %624 = vmatpush3.msra.mxu0 %v358_v25 }
  0x62   : > { %625 = vmatprep.subr.mxu0 %v373_v26 }
  0x63   : > { %626 = vmatpush3.msra.mxu0 %v357_v27 }
  0x64   : > { %627 = vmatprep.subr.mxu0 %v372_v28 }
  0x65   : > { %628 = vmatpush3.msra.mxu0 %v356_v29 }
  0x66   : > { %629 = vmatprep.subr.mxu0 %v371_v30 }
  0x67   : > { %630 = vmatpush3.msra.mxu0 %v355_v31 }
  0x68   : > { %631 = vmatprep.subr.mxu0 %v370_v32 }
  0x69   : > { %632 = vmatpush3.msra.mxu0 %v354_v33 }
  0x6a   : > { %633 = vmatprep.subr.mxu0 %v369_v34 }
  0x6b   : > { %634 = vmatpush3.msra.mxu0 %v353_v35 }
  0x6c   : > { %635 = vmatprep.subr.mxu0 %v368_v36 }
  0x6d   : > { %636 = vmatpush3.msra.mxu0 %v352_v37 }
  0x6e   : > { %637 = vmatprep.subr.mxu0 %v367_v38 }
  0x6f   : > { %638 = vmatpush3.msra.mxu0 %v351_v39 }
  0x70   : > { %639 = vmatprep.subr.mxu0 %v366_v40 }
  0x71   : > { %640 = vmatpush3.msra.mxu0 %v350_v41 }
  0xdc   : > { %v307_v10 = vpop.xlane.xlu0 %306 }
  0xdd   : > { %v309_v11 = vmul.f32 0.00390625, %v307_v10 }
  0xdf   : > { %v1069_v12 = vsub.f32 %v303_v0, %v309_v11  ;;  %v1071_v13 = vsub.f32 %v304_v1, %v309_v11 }
  0xe1   : > { %v312_v14 = vmul.f32 %v1069_v12, %v1069_v12  ;;  %v313_v15 = vmul.f32 %v1071_v13, %v1071_v13 }
  0xe3   : > { %v314_v16 = vadd.f32 %v313_v15, %v312_v14 }
  0xe5   : > { %315 = vadd.xlane.f32.xlu0 %v314_v16 }
 0x16e   : > { %v316_v42 = vpop.xlane.xlu0 %315 }
 0x16f   : > { %v317_v43 = vmul.f32 0.00390625, %v316_v42 }
 0x171   : > { %v318_v44 = vadd.f32 1e-05, %v317_v43 }
 0x173   : > { %729 = vrsqrt.f32 %v318_v44 }
 0x180   : > { %v730_v53 = vpop.eup %729 }
 0x181   : > { %v321_v54 = vmul.f32 %v730_v53, %v1071_v13  ;;  %v320_v57 = vmul.f32 %v730_v53, %v1069_v12 }
 0x183   : > { %v335_v58 = vmul.f32 %v331_v52, %v321_v54  ;;  %v334_v59 = vmul.f32 %v327_v51, %v320_v57 }
 0x185   : > { %v349_v60 = vadd.f32 %v345_v56, %v335_v58  ;;  %v348_v61 = vadd.f32 %v341_v55, %v334_v59 }
 0x187   : > { %453 = vmatprep.mubr.f32.mxu0 %v349_v60 }
 0x188   : > { %454 = vmatmul.mubr.f32.vlgmr.msra.gmra.mxu0 %v348_v61 }
 0x248   : > { %v641_v62 = vpop.f32.mrf.mxu0 }
 0x24a   : > { %v642_v0 = vpop.f32.mrf.mxu0 }
 0x24b   : > { %v643_v1 = vadd.f32 %v642_v0, %v641_v62 }
 0x24d   : > { %v456_v2 = vadd.f32 %v643_v1, %v603_v63 }
 0x24f   : > { %731 = vtanh.f32 %v456_v2 }
 0x25c   : > { %v732_v3 = vpop.eup %731 }
 0x25d   : > { %460 = vst [vmem:[%s299_s17] sm:$0xff] %v732_v3 }
 0x25e   : > { %826 = shalt.err (!%p823_p0)
}
 0x25f   : > { %s827_s1 = scalar_lea.hbm %s1090_s6, 128  ;;  %s831_s28 = scalar_lea.hbm %s1137_s5, 256 }
 0x260   : > { %p828_p1 = scmp.ne.s32.totalorder %s1090_s6, %s827_s1  ;;  %p832_p6 = scmp.lt.s32.totalorder %s1090_s6, %s1137_s5 }
 0x261   : > { %p833_p8 = scmp.lt.s32.totalorder %s831_s28, %s827_s1 }
 0x262   : > { %p829_p2 = pnand %p828_p1, %p1030_p12 }
 0x263   : > { %p834_p9 = por %p833_p8, %p832_p6 }
 0x264   : > { %p830_p4 = pneg %p829_p2 }
 0x266   : > { %p835_p3 = pnand %p834_p9, %p830_p4 }
 0x268   : > { %838 = shalt.err (!%p835_p3)
}
 0x269   : > { %654 = dma.vmem_to_hbm [thread:$0]  (%p1030_p12), %s477_s27, 128, %s1090_s6, %s462_s11  }
 0x26a PF: > { %s488_s16 = sand.u32 1, %s877_s18   ;;  %p1156_p11 = scmp.ne.s32.totalorder %s1146_s29, 0 }
 0x26b   : > { %p1157_p5 = scmp.ge.s32.totalorder %s897_s23, 2  ;;  %s489_s17 = scalar_lea.sflag [#allocation4], %s488_s16 }
 0x26d   : > { %p668_p7 = pnand %p1157_p5, %p1156_p11 }
 0x26f   : > { %p669_p10 = pneg %p668_p7 }
 0x271   : > { %872 = dma.done.wait (%p669_p10), %s489_s17, 128  }
 0x272   : > { %874 = vsyncadd (%p669_p10), %s489_s17, 4294967168  ;;  %s22_s23 = sadd.s32 1, %s897_s23   ;;  %s1158_s18 = smov %s881_s19 }
 0x273   : > { %p19_p13 = scmp.ge.s32.totalorder %s22_s23, 4   ;;  %s1159_s19 = smov %s885_s20 }
 0x274   : > { %s1160_s20 = smov %s1039_s12  ;;  %s1161_s21 = smov %s893_s22 }
 0x275   : > { %s1162_s22 = smov %s1164_s25  ;;  %21 = sbr.rel (!%p19_p13) target bundleno = 9 (0x9), region = 97 }
 0x27a   :  { %494 = vsyncpa [#allocation3], 1 }
 0x27b   :  { %496 = vsyncpa [#allocation3 + $0x1], 1 }
 0x27c   :  { %497 = vsyncpa [#allocation6], 1 }
 0x27d   :  { %498 = vsyncpa [#allocation4], 1 }
 0x27e   :  { %500 = vsyncpa [#allocation4 + $0x1], 1 }

</bundles_post_ra>
